<compile_context>
chip_gen: v7x
topology: tpu7x:2x2x1
jax: 0.10.0
libtpu: 0.0.40
codegen_flags: <defaults>
</compile_context>

<pallas_src>
import math

import jax
import jax.numpy as jnp
from jax.experimental import pallas as pl
from jax.experimental.pallas import tpu as pltpu


def _sinusoidal_kernel(t_ref, emb_ref, out_ref):
    # t_ref:   (1, TILE_B)           float32 — timesteps, lane-dense
    # emb_ref: (half_dim, 1)         float32 — frequencies, sublane column
    # out_ref: (2, half_dim, TILE_B) float32 — plane 0 = sin, plane 1 = cos
    arg = emb_ref[...] * t_ref[...]          # (half_dim, TILE_B) broadcast (VPU)
    out_ref[0] = jnp.sin(arg)                # aligned slab writes, no concat
    out_ref[1] = jnp.cos(arg)


def make_sinusoidal_embedding_buffer(dim: int, theta: int = 10000) -> jnp.ndarray:
    """Deterministic buffer init, mirroring the PyTorch __init__ (shape (1, half_dim))."""
    half_dim = dim // 2
    scale = math.log(theta) / (half_dim - 1)
    return jnp.exp(jnp.arange(half_dim, dtype=jnp.float32) * -scale).reshape(1, -1)


def _round_up(x: int, m: int) -> int:
    return ((x + m - 1) // m) * m


def sinusoidal_position_embedding(t: jnp.ndarray, emb: jnp.ndarray,
                                  *, tile_b: int = 512) -> jnp.ndarray:
    """t: arbitrary-shaped timesteps; emb: (1, half_dim) buffer.

    Returns (t.size, 2 * half_dim) float32, identical to the PyTorch forward.
    """
    half_dim = emb.shape[-1]
    dim = 2 * half_dim

    t_flat = t.reshape(-1).astype(jnp.float32)
    B = t_flat.shape[0]

    # Lane-dense tiling: batch lives on the lane (last) axis. Pad B to a
    # multiple of a 128-aligned tile so every store is an unmasked full-lane vst.
    tile_b = min(tile_b, _round_up(B, 128))
    Bp = _round_up(B, tile_b)
    if Bp != B:
        t_flat = jnp.pad(t_flat, (0, Bp - B))

    t_row = t_flat.reshape(1, Bp)                            # (1, Bp)
    emb_col = emb.reshape(half_dim, 1).astype(jnp.float32)   # (half_dim, 1)

    out = pl.pallas_call(
        _sinusoidal_kernel,
        out_shape=jax.ShapeDtypeStruct((2, half_dim, Bp), jnp.float32),
        grid=(Bp // tile_b,),
        in_specs=[
            pl.BlockSpec((1, tile_b), lambda i: (0, i)),      # t tile (lane axis)
            pl.BlockSpec((half_dim, 1), lambda i: (0, 0)),    # emb stays resident
        ],
        out_specs=pl.BlockSpec((2, half_dim, tile_b), lambda i: (0, 0, i)),
        compiler_params=pltpu.CompilerParams(
            dimension_semantics=("parallel",)),               # shard across TCs (v7x)
    )(t_row, emb_col)

    # (2, half_dim, Bp) -> (Bp, 2, half_dim) -> (Bp, dim) == cat(sin, cos),
    # then drop padded rows. Wrapper-side layout plumbing handled by XLA.
    out = jnp.transpose(out, (2, 0, 1)).reshape(Bp, dim)
    return out[:B]


def _reference(t: jnp.ndarray, emb: jnp.ndarray) -> jnp.ndarray:
    arg = t.reshape(-1, 1).astype(jnp.float32) * emb
    return jnp.concatenate([jnp.sin(arg), jnp.cos(arg)], axis=-1)


if __name__ == "__main__":
    dim = 32
    batch = 8

    emb_buf = make_sinusoidal_embedding_buffer(dim, theta=10000)

    key = jax.random.PRNGKey(0)
    # Timesteps, e.g. diffusion steps in [0, 1000)
    t = jax.random.uniform(key, (batch,), dtype=jnp.float32,
                           minval=0.0, maxval=1000.0)

    out = jax.block_until_ready(sinusoidal_position_embedding(t, emb_buf))
    ref = _reference(t, emb_buf)

    assert out.shape == (batch, dim), out.shape
    assert out.dtype == jnp.float32, out.dtype
    assert jnp.allclose(out, ref, atol=1e-5, rtol=1e-5), "mismatch vs reference"

    print("KERNEL_OK")
</pallas_src>

<mosaic_0001>
module attributes {stable_mosaic.version = 11 : i64} {
  func.func @_sinusoidal_kernel(%arg0: i32, %arg1: memref<1x128xf32, #tpu.memory_space<vmem>>, %arg2: memref<16x1xf32, #tpu.memory_space<vmem>>, %arg3: memref<2x16x128xf32, #tpu.memory_space<vmem>>) attributes {dimension_semantics = [#tpu.dimension_semantics<parallel>], iteration_bounds = array<i64: 1>, scalar_prefetch = 0 : i64, scratch_operands = 0 : i64, tpu.core_type = #tpu.core_type<tc>, window_params = [{transform_indices = @transform_0, window_bounds = array<i64: 1, 128>}, {pipeline_mode = #tpu.pipeline_mode<synchronous>, transform_indices = @transform_1, window_bounds = array<i64: 16, 1>}, {transform_indices = @transform_2, window_bounds = array<i64: 2, 16, 128>}]} {
    %c0 = arith.constant 0 : index
    %c0_0 = arith.constant 0 : index
    %0 = vector.load %arg2[%c0, %c0_0] : memref<16x1xf32, #tpu.memory_space<vmem>>, vector<16x1xf32>
    %c0_1 = arith.constant 0 : index
    %c0_2 = arith.constant 0 : index
    %1 = vector.load %arg1[%c0_1, %c0_2] : memref<1x128xf32, #tpu.memory_space<vmem>>, vector<1x128xf32>
    %2 = vector.broadcast %0 : vector<16x1xf32> to vector<16x128xf32>
    %3 = vector.broadcast %1 : vector<1x128xf32> to vector<16x128xf32>
    %4 = arith.mulf %2, %3 : vector<16x128xf32>
    %5 = math.sin %4 : vector<16x128xf32>
    %c0_3 = arith.constant 0 : index
    %c0_4 = arith.constant 0 : index
    %c0_5 = arith.constant 0 : index
    %6 = vector.load %arg3[%c0_3, %c0_4, %c0_5] : memref<2x16x128xf32, #tpu.memory_space<vmem>>, vector<1x16x128xf32>
    %7 = vector.shape_cast %6 : vector<1x16x128xf32> to vector<16x128xf32>
    %8 = vector.shape_cast %5 : vector<16x128xf32> to vector<1x16x128xf32>
    tpu.vector_store %arg3[%c0_3, %c0_4, %c0_5], %8 {strides = array<i32>} : memref<2x16x128xf32, #tpu.memory_space<vmem>>, vector<1x16x128xf32>,
    %9 = math.cos %4 : vector<16x128xf32>
    %c1 = arith.constant 1 : index
    %c0_6 = arith.constant 0 : index
    %c0_7 = arith.constant 0 : index
    %10 = vector.load %arg3[%c1, %c0_6, %c0_7] : memref<2x16x128xf32, #tpu.memory_space<vmem>>, vector<1x16x128xf32>
    %11 = vector.shape_cast %10 : vector<1x16x128xf32> to vector<16x128xf32>
    %12 = vector.shape_cast %9 : vector<16x128xf32> to vector<1x16x128xf32>
    tpu.vector_store %arg3[%c1, %c0_6, %c0_7], %12 {strides = array<i32>} : memref<2x16x128xf32, #tpu.memory_space<vmem>>, vector<1x16x128xf32>,
    return
  }
  func.func @transform_0(%arg0: i32) -> (i32, i32) {
    %c0_i32 = arith.constant 0 : i32
    %c0_i32_0 = arith.constant 0 : i32
    return %c0_i32, %arg0 : i32, i32
  }
  func.func @transform_1(%arg0: i32) -> (i32, i32) {
    %c0_i32 = arith.constant 0 : i32
    %c0_i32_0 = arith.constant 0 : i32
    %c0_i32_1 = arith.constant 0 : i32
    return %c0_i32, %c0_i32_0 : i32, i32
  }
  func.func @transform_2(%arg0: i32) -> (i32, i32, i32) {
    %c0_i32 = arith.constant 0 : i32
    %c0_i32_0 = arith.constant 0 : i32
    %c0_i32_1 = arith.constant 0 : i32
    return %c0_i32, %c0_i32_0, %arg0 : i32, i32, i32
  }
}

</mosaic_0001>

<bundles_post_ra>
// kernel: tpu_custom_call.1
= control target key start
LH: loop header
LB: loop body
LE: loop exit
PB: predicated region body
PF: predicated region fallthrough
CT: control target
= control target key end

     0   :  { %v536_v1 = vmov 0   ;;  %s642_s0 = inlined_call_operand.vmem [shape: f32[1,128], index: 0, kind: input, shape index: {}]   ;;  %s643_s1 = inlined_call_operand.vmem [shape: f32[16,1], index: 1, kind: input, shape index: {}]   ;;  %s644_s2 = inlined_call_operand.hbm [shape: f32[2,16,128], index: 2, kind: output, shape index: {}]  }
   0x1   :  { %v12_v0 = vld [vmem:[%s643_s1] sm:$0xff]  ;;  %503 = vset.pattern.permute.xlu0 %v536_v1  ;;  %v13_v2 = vld [vmem:[%s643_s1 + $0x8] sm:$0xff] }
   0x2   :  { %17 = vperm.xlu0 %503, %v12_v0  }
   0x3   :  { %7 = vsyncpa [#allocation3], 0  ;;  %v468_v3 = vld [vmem:[%s642_s0] ss:$0 sm:$0xff]  ;;  %v537_v24 = vmov 683565275  }
   0x4   :  { %v538_v28 = vmov 2475754826   ;;  %v539_v30 = vmov 2131351028   ;;  %v540_v32 = vmov 2102212464  }
   0x5   :  { %v541_v34 = vmov 920167782   ;;  %v542_v41 = vmov 1326507024   ;;  %s543_s0 = smov [#allocation2]  }
   0x6   :  { %22 = vperm.xlu0 %503, %v13_v2   ;;  %s457_s1 = sshll.u32 %s543_s0, 4  ;;  %s458_s1 = int_to_ptr.vmem [resolvable:$true] %s457_s1 }
   0x7   :  { %s512_s15 = scalar_lea.vmem %s458_s1, 512  ;;  %p517_p1 = scmp.lt.s32.totalorder %s458_s1, %s458_s1 }
   0x8   :  { %p513_p0 = scmp.ne.s32.totalorder %s458_s1, %s512_s15  ;;  %p518_p2 = scmp.lt.s32.totalorder %s512_s15, %s512_s15 }
   0xa   :  { %p519_p3 = por %p518_p2, %p517_p1 }
   0xc   :  { %p520_p4 = pnand %p519_p3, %p513_p0 }
  0x81   :  { %v18_v4 = vpop.permute.xlu0 %17 }
  0x82   :  { %v570_v5 = vmul.f32 %v468_v3, %v18_v4 }
  0x84   :  { %v33_v6 = vand.u32 2147483647, %v570_v5  ;;  %v36_v7 = vand.u32 2139095040, %v570_v5  ;;  %vm35_vm14 = vcmp.lt.s32.totalorder %v570_v5, 0 }
  0x85   :  { %v23_v8 = vpop.permute.xlu0 %22 }
  0x86   :  { %v37_v9 = vshrl.u32 %v36_v7, 23  ;;  %v574_v10 = vmul.f32 %v468_v3, %v23_v8  ;;  %v40_v11 = vand.u32 8388607, %v33_v6  ;;  %vm34_vm15 = vcmp.le.f32.partialorder %v33_v6, 0.7853982 }
  0x88   :  { %v469_v12 = vadd.s32 4294967169, %v37_v9  ;;  %v140_v13 = vand.u32 2139095040, %v574_v10  ;;  %v41_v15 = vor.u32 8388608, %v40_v11  ;;  %v137_v17 = vand.u32 2147483647, %v574_v10 }
  0x8a   :  { %v43_v14 = vadd.s32 1, %v469_v12  ;;  %v141_v16 = vshrl.u32 %v140_v13, 23  ;;  %v580_v22 = vshll.u32 %v41_v15, 8  ;;  %v144_v26 = vand.u32 8388607, %v137_v17 }
  0x8c   :  { %vm44_vm0 = vcmp.gt.s32.totalorder %v43_v14, 0  ;;  %v473_v19 = vadd.s32 4294967169, %v141_v16  ;;  %v145_v56 = vor.u32 8388608, %v144_v26 }
  0x8d   :  { %v45_v18 = vsel %vm44_vm0, %v43_v14, 0  ;;  %vm139_vm0 = vcmp.lt.s32.totalorder %v574_v10, 0 }
  0x8e   :  { %v46_v20 = vshrl.u32 %v45_v18, 5  ;;  %v47_v21 = vand.u32 31, %v45_v18  ;;  %v147_v27 = vadd.s32 1, %v473_v19  ;;  %v185_v7 = vshll.u32 %v145_v56, 8 }
  0x90   :  { %v48_v23 = vsub.s32 32, %v47_v21  ;;  %v50_v25 = vshll.u32 %v537_v24, %v47_v21  ;;  %v53_v29 = vshll.u32 %v538_v28, %v47_v21  ;;  %v56_v31 = vshll.u32 %v539_v30, %v47_v21 }
  0x91   :  { %v59_v33 = vshll.u32 %v540_v32, %v47_v21  ;;  %v62_v35 = vshll.u32 %v541_v34, %v47_v21  ;;  %vm65_vm1 = vcmp.lt.s32.totalorder %v46_v20, 1  ;;  %vm67_vm2 = vcmp.lt.s32.totalorder %v46_v20, 3 }
  0x92   :  { %v51_v36 = vshrl.u32 %v538_v28, %v48_v23  ;;  %v54_v37 = vshrl.u32 %v539_v30, %v48_v23  ;;  %v57_v38 = vshrl.u32 %v540_v32, %v48_v23  ;;  %v49_v39 = vshrl.u32 %v537_v24, %v48_v23 }
  0x93   :  { %v60_v40 = vshrl.u32 %v541_v34, %v48_v23  ;;  %v63_v42 = vshrl.u32 %v542_v41, %v48_v23  ;;  %vm148_vm3 = vcmp.gt.s32.totalorder %v147_v27, 0  ;;  %vm68_vm4 = vcmp.lt.s32.totalorder %v46_v20, 4 }
  0x94   :  { %v52_v43 = vor.u32 %v51_v36, %v50_v25  ;;  %v55_v44 = vor.u32 %v54_v37, %v53_v29  ;;  %v58_v45 = vor.u32 %v57_v38, %v56_v31  ;;  %v149_v48 = vsel %vm148_vm3, %v147_v27, 0 }
  0x95   :  { %v61_v46 = vor.u32 %v60_v40, %v59_v33  ;;  %v64_v47 = vor.u32 %v63_v42, %v62_v35  ;;  %vm66_vm5 = vcmp.lt.s32.totalorder %v46_v20, 2  ;;  %v151_v59 = vand.u32 31, %v149_v48 }
  0x96   :  { %v69_v49 = vsel %vm65_vm1, %v49_v39, %v52_v43  ;;  %v70_v50 = vsel %vm68_vm4, %v58_v45, 2102212464  ;;  %v73_v51 = vsel %vm65_vm1, %v52_v43, %v55_v44  ;;  %v77_v52 = vsel %vm65_vm1, %v55_v44, %v58_v45 }
  0x97   :  { %v71_v53 = vsel %vm67_vm2, %v55_v44, %v70_v50  ;;  %v74_v54 = vsel %vm68_vm4, %v61_v46, 920167782  ;;  %v78_v55 = vsel %vm68_vm4, %v64_v47, 1326507024  ;;  %v150_v3 = vshrl.u32 %v149_v48, 5 }
  0x98   :  { %v75_v57 = vsel %vm67_vm2, %v58_v45, %v74_v54  ;;  %v79_v58 = vsel %vm67_vm2, %v61_v46, %v78_v55  ;;  %v72_v60 = vsel %vm66_vm5, %v69_v49, %v71_v53  ;;  %v152_v4 = vsub.s32 32, %v151_v59 }
  0x99   :  { %v76_v61 = vsel %vm66_vm5, %v73_v51, %v75_v57  ;;  %v80_v62 = vsel %vm66_vm5, %v77_v52, %v79_v58  ;;  %v88_v8 = vmul.u32 %v580_v22, %v72_v60  ;;  %v154_v9 = vshll.u32 %v537_v24, %v151_v59 }
  0x9a   :  { %v593_v63 = vmul.u32.u64.low %v580_v22, %v80_v62  ;;  %v594_v0 = vmul.u32.u64.high %v580_v22, %v80_v62, %v593_v63  ;;  %v597_v1 = vmul.u32.u64.low %v580_v22, %v76_v61  ;;  %v598_v2 = vmul.u32.u64.high %v580_v22, %v76_v61, %v597_v1 }
  0x9b   :  { %v157_v11 = vshll.u32 %v538_v28, %v151_v59  ;;  %v160_v12 = vshll.u32 %v539_v30, %v151_v59  ;;  %v155_v13 = vshrl.u32 %v538_v28, %v152_v4  ;;  %v158_v14 = vshrl.u32 %v539_v30, %v152_v4 }
  0x9c   :  { %v161_v15 = vshrl.u32 %v540_v32, %v152_v4  ;;  %v163_v16 = vshll.u32 %v540_v32, %v151_v59  ;;  %vm90_vm6 = vc.u32 %v594_v0, %v597_v1  ;;  %v91_v18 = vadd.s32 1, %v598_v2 }
  0x9d   :  { %v164_v19 = vshrl.u32 %v541_v34, %v152_v4  ;;  %v166_v20 = vshll.u32 %v541_v34, %v151_v59  ;;  %v156_v21 = vor.u32 %v155_v13, %v154_v9  ;;  %v159_v23 = vor.u32 %v158_v14, %v157_v11 }
  0x9e   :  { %v162_v25 = vor.u32 %v161_v15, %v160_v12  ;;  %v167_v26 = vshrl.u32 %v542_v41, %v152_v4  ;;  %v92_v22 = vsel %vm90_vm6, %v91_v18, %v598_v2  ;;  %vm169_vm7 = vcmp.lt.s32.totalorder %v150_v3, 1 }
  0x9f   :  { %v165_v27 = vor.u32 %v164_v19, %v163_v16  ;;  %vm172_vm8 = vcmp.lt.s32.totalorder %v150_v3, 4  ;;  %v93_v28 = vadd.s32 %v92_v22, %v88_v8  ;;  %vm171_vm9 = vcmp.lt.s32.totalorder %v150_v3, 3 }
  0xa0   :  { %v168_v29 = vor.u32 %v167_v26, %v166_v20  ;;  %v174_v30 = vsel %vm172_vm8, %v162_v25, 2102212464  ;;  %v153_v31 = vshrl.u32 %v537_v24, %v152_v4  ;;  %v177_v32 = vsel %vm169_vm7, %v156_v21, %v159_v23 }
  0xa1   :  { %v178_v33 = vsel %vm172_vm8, %v165_v27, 920167782  ;;  %v181_v35 = vsel %vm169_vm7, %v159_v23, %v162_v25  ;;  %v94_v36 = vadd.s32 536870912, %v93_v28  ;;  %vm170_vm10 = vcmp.lt.s32.totalorder %v150_v3, 2 }
  0xa2   :  { %v179_v34 = vsel %vm171_vm9, %v162_v25, %v178_v33  ;;  %v182_v37 = vsel %vm172_vm8, %v168_v29, 1326507024  ;;  %v173_v38 = vsel %vm169_vm7, %v153_v31, %v156_v21  ;;  %v175_v39 = vsel %vm171_vm9, %v159_v23, %v174_v30 }
  0xa3   :  { %v180_v40 = vsel %vm170_vm10, %v177_v32, %v179_v34  ;;  %v183_v41 = vsel %vm171_vm9, %v165_v27, %v182_v37  ;;  %v95_v42 = vshrl.u32 %v94_v36, 30  ;;  %v176_v48 = vsel %vm170_vm10, %v173_v38, %v175_v39 }
  0xa4   :  { %v184_v43 = vsel %vm170_vm10, %v181_v35, %v183_v41  ;;  %v608_v44 = vmul.u32.u64.low %v185_v7, %v180_v40  ;;  %v609_v45 = vmul.u32.u64.high %v185_v7, %v180_v40, %v608_v44  ;;  %v192_v51 = vmul.u32 %v185_v7, %v176_v48 }
  0xa5   :  { %v611_v46 = vmul.u32.u64.low %v185_v7, %v184_v43  ;;  %v612_v47 = vmul.u32.u64.high %v185_v7, %v184_v43, %v611_v46  ;;  %v96_v24 = vshll.u32 %v95_v42, 30  ;;  %v89_v63 = vadd.s32 %v597_v1, %v594_v0 }
  0xa6   :  { %v195_v50 = vadd.s32 1, %v609_v45  ;;  %v119_v21 = vsub.s32 4, %v95_v42  ;;  %vm138_vm1 = vcmp.le.f32.partialorder %v137_v17, 0.7853982  ;;  %vm125_vm8 = vweird.f32 %v570_v5 }
  0xa7   :  { %v97_v49 = vsub.s32 %v93_v28, %v96_v24  ;;  %vm194_vm11 = vc.u32 %v612_v47, %v608_v44  ;;  %v193_v0 = vadd.s32 %v608_v44, %v612_v47 }
  0xa8   :  { %v196_v53 = vsel %vm194_vm11, %v195_v50, %v609_v45  ;;  %v120_v30 = vsel %vm35_vm14, %v119_v21, %v95_v42 }
  0xa9   :  { %v99_v52 = vsub.s32 0, %v97_v49  ;;  %v197_v54 = vadd.s32 %v196_v53, %v192_v51  ;;  %v122_v35 = vsel %vm34_vm15, 0, %v120_v30 }
  0xaa   :  { %v126_v38 = vadd.s32 3, %v122_v35  ;;  %v336_v41 = vand.u32 3, %v122_v35 }
  0xab   :  { %v470_v55 = vmin.u32 %v99_v52, %v97_v49  ;;  %v198_v56 = vadd.s32 536870912, %v197_v54 }
  0xac   :  { %v127_v44 = vand.u32 3, %v126_v38  ;;  %vm341_vm2 = vcmp.eq.s32.totalorder %v336_v41, 2  ;;  %vm338_vm5 = vcmp.eq.s32.totalorder %v336_v41, 0  ;;  %vm337_vm7 = vcmp.lt.s32.totalorder %v336_v41, 2 }
  0xad   :  { %v101_v57 = vclz %v470_v55  ;;  %v199_v58 = vshrl.u32 %v198_v56, 30 }
  0xae   :  { %vm132_vm3 = vcmp.eq.s32.totalorder %v127_v44, 2  ;;  %vm129_vm4 = vcmp.eq.s32.totalorder %v127_v44, 0  ;;  %vm128_vm6 = vcmp.lt.s32.totalorder %v127_v44, 2 }
  0xaf   :  { %v471_v59 = vadd.s32 4294967294, %v101_v57  ;;  %v200_v60 = vshll.u32 %v199_v58, 30  ;;  %v223_v40 = vsub.s32 4, %v199_v58 }
  0xb1   :  { %vm472_vm12 = vcmp.lt.s32.totalorder %v471_v59, 0  ;;  %v201_v62 = vsub.s32 %v197_v54, %v200_v60  ;;  %v224_v42 = vsel %vm139_vm0, %v223_v40, %v199_v58 }
  0xb2   :  { %v104_v61 = vsel %vm472_vm12, 0, %v471_v59 }
  0xb3   :  { %v105_v2 = vsub.s32 32, %v104_v61  ;;  %v109_v3 = vsub.s32 4294967266, %v104_v61  ;;  %v203_v4 = vsub.s32 0, %v201_v62  ;;  %v106_v7 = vshll.u32 %v97_v49, %v104_v61 }
  0xb4   :  { %v226_v49 = vsel %vm138_vm1, 0, %v224_v42 }
  0xb5   :  { %v107_v8 = vshrl.u32 %v89_v63, %v105_v2  ;;  %v110_v9 = vadd.s32 127, %v109_v3  ;;  %v474_v11 = vmin.u32 %v203_v4, %v201_v62  ;;  %v230_v55 = vadd.s32 3, %v226_v49 }
  0xb6   :  { %v439_v59 = vand.u32 3, %v226_v49 }
  0xb7   :  { %v108_v12 = vor.u32 %v107_v8, %v106_v7  ;;  %v111_v13 = vshll.u32 %v110_v9, 23  ;;  %v205_v14 = vclz %v474_v11  ;;  %v231_v58 = vand.u32 3, %v230_v55 }
  0xb8   :  { %vm444_vm10 = vcmp.eq.s32.totalorder %v439_v59, 2  ;;  %vm441_vm12 = vcmp.eq.s32.totalorder %v439_v59, 0 }
  0xb9   :  { %v112_v15 = vor.u32 4788187, %v111_v13  ;;  %v475_v16 = vadd.s32 4294967294, %v205_v14  ;;  %v115_v19 = vcvt.s32.f32 %v108_v12  ;;  %vm236_vm9 = vcmp.eq.s32.totalorder %v231_v58, 2 }
  0xba   :  { %vm233_vm11 = vcmp.eq.s32.totalorder %v231_v58, 0 }
  0xbb   :  { %v113_v18 = vand.u32 2147483647, %v112_v15  ;;  %vm476_vm13 = vcmp.lt.s32.totalorder %v475_v16, 0 }
  0xbc   :  { %v208_v23 = vsel %vm476_vm13, 0, %v475_v16  ;;  %vm232_vm13 = vcmp.lt.s32.totalorder %v231_v58, 2 }
  0xbd   :  { %v116_v20 = vmul.f32 %v115_v19, %v113_v18  ;;  %v209_v1 = vsub.s32 32, %v208_v23  ;;  %v213_v25 = vsub.s32 4294967266, %v208_v23  ;;  %v210_v22 = vshll.u32 %v201_v62, %v208_v23 }
  0xbf   :  { %v117_v26 = vxor.u32 2147483648, %v116_v20  ;;  %v211_v27 = vshrl.u32 %v193_v0, %v209_v1  ;;  %v214_v28 = vadd.s32 127, %v213_v25 }
  0xc1   :  { %v118_v29 = vsel %vm35_vm14, %v117_v26, %v116_v20  ;;  %v212_v32 = vor.u32 %v211_v27, %v210_v22  ;;  %v215_v33 = vshll.u32 %v214_v28, 23  ;;  %vm440_vm14 = vcmp.lt.s32.totalorder %v439_v59, 2 }
  0xc2   :  { %v121_v31 = vsel %vm34_vm15, %v570_v5, %v118_v29  ;;  %vm229_vm15 = vweird.f32 %v574_v10 }
  0xc3   :  { %504 = vcosq.f32 %v121_v31  ;;  %v216_v36 = vor.u32 4788187, %v215_v33  ;;  %v219_v37 = vcvt.s32.f32 %v212_v32 }
  0xc4   :  { %506 = vsinq.f32 %v121_v31 }
  0xc5   :  { %v217_v34 = vand.u32 2147483647, %v216_v36 }
  0xc7   :  { %v220_v39 = vmul.f32 %v219_v37, %v217_v34 }
  0xc9   :  { %v221_v43 = vxor.u32 2147483648, %v220_v39 }
  0xcb   :  { %v222_v6 = vsel %vm139_vm0, %v221_v43, %v220_v39 }
  0xcc   :  { %v225_v46 = vsel %vm138_vm1, %v574_v10, %v222_v6 }
  0xcd   :  { %v505_v45 = vpop.eup %504  ;;  %508 = vcosq.f32 %v225_v46 }
  0xce   :  { %v507_v47 = vpop.eup %506  ;;  %v133_v24 = vxor.u32 2147483648, %v505_v45  ;;  %510 = vsinq.f32 %v225_v46 }
  0xcf   :  { %v130_v48 = vxor.u32 2147483648, %v507_v47 }
  0xd0   :  { %v134_v50 = vsel %vm132_vm3, %v133_v24, %v507_v47  ;;  %v343_v51 = vsel %vm341_vm2, %v133_v24, %v507_v47 }
  0xd1   :  { %v131_v52 = vsel %vm129_vm4, %v505_v45, %v130_v48  ;;  %v340_v17 = vsel %vm338_vm5, %v505_v45, %v130_v48 }
  0xd2   :  { %v135_v53 = vsel %vm128_vm6, %v131_v52, %v134_v50  ;;  %v344_v54 = vsel %vm337_vm7, %v340_v17, %v343_v51 }
  0xd3   :  { %v136_v56 = vsel %vm125_vm8, nan, %v135_v53  ;;  %v345_v57 = vsel %vm125_vm8, nan, %v344_v54 }
  0xd4   :  { %241 = vst [vmem:[#allocation2] sm:$0xff] %v136_v56  ;;  %450 = vst [vmem:[#allocation2 + $0x10] sm:$0xff] %v345_v57 }
  0xd7   :  { %v509_v60 = vpop.eup %508 }
  0xd8   :  { %v511_v61 = vpop.eup %510  ;;  %v237_v62 = vxor.u32 2147483648, %v509_v60 }
  0xd9   :  { %v234_v63 = vxor.u32 2147483648, %v511_v61 }
  0xda   :  { %v238_v2 = vsel %vm236_vm9, %v237_v62, %v511_v61  ;;  %v446_v5 = vsel %vm444_vm10, %v237_v62, %v511_v61 }
  0xdb   :  { %v235_v3 = vsel %vm233_vm11, %v509_v60, %v234_v63  ;;  %v443_v4 = vsel %vm441_vm12, %v509_v60, %v234_v63 }
  0xdc   :  { %v239_v7 = vsel %vm232_vm13, %v235_v3, %v238_v2  ;;  %v447_v8 = vsel %vm440_vm14, %v443_v4, %v446_v5 }
  0xdd   :  { %v240_v9 = vsel %vm229_vm15, nan, %v239_v7  ;;  %v448_v11 = vsel %vm229_vm15, nan, %v447_v8 }
  0xde   :  { %242 = vst [vmem:[#allocation2 + $0x8] sm:$0xff] %v240_v9  ;;  %451 = vst [vmem:[#allocation2 + $0x18] sm:$0xff] %v448_v11 }
  0xdf   :  { %523 = shalt.err (!%p520_p4)
}
  0xe0   :  { %s524_s18 = scalar_lea.hbm %s644_s2, 512 }
  0xe1   :  { %p525_p5 = scmp.ne.s32.totalorder %s644_s2, %s524_s18  ;;  %p528_p6 = scmp.lt.u32.totalorder %s524_s18, %s644_s2 }
  0xe3   :  { %p530_p7 = pnand %p528_p6, %p525_p5 }
  0xe5   :  { %533 = shalt.err (!%p530_p7)
}
  0xe6   :  { %s544_s23 = smov 128   ;;  %s545_s24 = smov 8  }
  0xe7   :  { %463 = dma.vmem_to_hbm [thread:$0]  %s458_s1, 512, %s644_s2, [#allocation3], %s544_s23, %s544_s23, %s545_s24  }
  0xe8   :  { %534 = dma.done.wait [#allocation3], 512  }
  0xe9   :  { %535 = vsyncadd [#allocation3], 4294966784 }
  0xea   :  { %467 = vsyncpa [#allocation3], 1 }

</bundles_post_ra>
